<compile_context>
chip_gen: v5e
topology: v5e:2x2
jax: 0.10.0
libtpu: 0.0.40
codegen_flags: <defaults>
</compile_context>

<pallas_src>
import functools

import jax
import jax.numpy as jnp
from jax.experimental import pallas as pl
from jax.experimental.pallas import tpu as pltpu


def _alpha_loss_kernel(vals_ref, yp_ref, pol_ref, out_ref, pacc_ref, vacc_ref,
                       *, batch, needs_mask):
    i = pl.program_id(1)
    tile_b, act = yp_ref.shape

    @pl.when(i == 0)
    def _():
        pacc_ref[...] = jnp.zeros_like(pacc_ref)
        vacc_ref[...] = jnp.zeros_like(vacc_ref)

    # ---- load current tiles (cast to f32 for accumulation) -------------------
    yp = yp_ref[...].astype(jnp.float32)            # (tile_b, A)
    pol = pol_ref[...].astype(jnp.float32)          # (tile_b, A)
    vals = vals_ref[...].astype(jnp.float32)        # (2, tile_b) lane-dense
    d = vals[0:1, :] - vals[1:2, :]                 # (1, tile_b)
    sq = d * d

    if needs_mask:
        # Global row index of this tile (works for clamped duplicate tiles too:
        # the logical rows are >= batch so everything masks to zero).
        step = pl.program_id(0) * pl.num_programs(1) + i
        row0 = step * tile_b
        rows = jax.lax.broadcasted_iota(jnp.int32, (tile_b, 1), 0) + row0
        rmask = rows < batch                                        # (tile_b, 1)
        # Mask y_policy BEFORE the log: garbage tail rows could be negative
        # and produce NaN through log(); mask policy to 0 so nothing leaks in.
        yp = jnp.where(rmask, yp, jnp.float32(1.0))
        pol = jnp.where(rmask, pol, jnp.float32(0.0))
        lanes = jax.lax.broadcasted_iota(jnp.int32, (1, tile_b), 1) + row0
        sq = jnp.where(lanes < batch, sq, jnp.float32(0.0))

    # ---- policy cross-entropy contribution (VPU + EUP) -----------------------
    prod = -pol * jnp.log(jnp.float32(1e-8) + yp)   # (tile_b, A)

    if tile_b % 8 == 0:
        # Pure cross-vreg adds: reduce tile_b rows down to 8 sublanes; the
        # cross-sublane / cross-lane reduce is deferred to the epilogue.
        pacc_ref[...] += prod.reshape(tile_b // 8, 8, act).sum(axis=0)
    else:
        # Single-tile odd-B fallback (one grid step, cost irrelevant).
        pacc_ref[0:1, :] += jnp.sum(prod, axis=0, keepdims=True)

    # ---- value MSE contribution: per-lane partial sums -----------------------
    vacc_ref[...] += sq                             # (1, tile_b)

    @pl.when(i == pl.num_programs(1) - 1)
    def _():
        total = jnp.sum(pacc_ref[...]) + jnp.sum(vacc_ref[...])
        out_ref[...] = jnp.broadcast_to(total, out_ref.shape)


def _tensorcores_per_chip():
    """2 TensorCores per chip on v7x, 1 on v5e/v6e. Conservative on failure."""
    try:
        kind = jax.devices()[0].device_kind.lower()
    except Exception:
        return 1
    return 2 if "v7" in kind else 1


def alpha_loss(y_value, v, y_policy, policy, *,
               vmem_budget_bytes=40 << 20, max_tile_b=None):
    """AlphaZero loss: mean((y_value - v)^2 + sum(-policy*log(1e-8+y_policy), -1))."""
    B, A = y_policy.shape
    assert policy.shape == (B, A)
    assert y_value.size == B and v.size == B

    yp_it = jnp.dtype(y_policy.dtype).itemsize
    pol_it = jnp.dtype(policy.dtype).itemsize

    # One lane-dense (2, B) f32 stream for both value tensors (tiny copy; keeps
    # the whole forward pass inside the kernel without two partial-lane DMAs).
    vals = jnp.concatenate(
        [y_value.reshape(1, B).astype(jnp.float32),
         v.reshape(1, B).astype(jnp.float32)], axis=0)

    # ---- tile selection: 512–1024-row sweet spot, capped by a v7x-safe budget
    # for the double-buffered input streams (true itemsizes, not hard-coded 4B).
    bytes_per_row = 2 * (A * (yp_it + pol_it) + 2 * 4)       # 2 = double-buffer
    cap_rows = max(128, int(vmem_budget_bytes // bytes_per_row) // 128 * 128)
    tile_b = int(min(1024, cap_rows))
    if max_tile_b is not None:
        tile_b = min(tile_b, max(128, (int(max_tile_b) // 128) * 128))
    if B <= tile_b:
        tile_b = B                  # single tile; block == full array dims
    n_tiles = pl.cdiv(B, tile_b)

    cost = pl.CostEstimate(
        flops=4 * B * A + 3 * B,
        transcendentals=B * A,
        bytes_accessed=B * A * (yp_it + pol_it) + 2 * B * 4 + 8 * 128 * 4,
    )

    def _build(nsplits, core_parallel):
        tiles_per_split = pl.cdiv(n_tiles, nsplits)
        n_tiles_total = nsplits * tiles_per_split
        needs_mask = (n_tiles_total * tile_b != B)
        clamp = (n_tiles_total != n_tiles)   # odd tile count split across 2 TCs

        def tile_idx(c, i):
            t = c * tiles_per_split + i
            if clamp:
                # Duplicate (clamped) tiles are fully masked out in-kernel.
                t = jnp.minimum(t, n_tiles - 1)
            return t

        pol_map = lambda c, i: (tile_idx(c, i), 0)
        val_map = lambda c, i: (0, tile_idx(c, i))

        kernel = functools.partial(_alpha_loss_kernel,
                                   batch=B, needs_mask=needs_mask)

        # Raise the scoped VMEM limit to back the chosen tile; stays < 64 MiB
        # so it is valid on v7x as well as v5e/v6e.
        needed = (2 * tile_b * A * (yp_it + pol_it)      # policy double-buffers
                  + 2 * 2 * tile_b * 4                   # value double-buffer
                  + 8 * A * 4 + tile_b * 4               # accumulators
                  + 2 * 8 * 128 * 4)                     # output buffers
        vmem_limit = int(min(60 << 20, max(32 << 20, needed + (4 << 20))))

        dim_sem = ((pltpu.CORE_PARALLEL, pltpu.ARBITRARY) if core_parallel
                   else ("arbitrary", "arbitrary"))

        out = pl.pallas_call(
            kernel,
            out_shape=jax.ShapeDtypeStruct((nsplits, 8, 128), jnp.float32),
            grid_spec=pltpu.PrefetchScalarGridSpec(
                num_scalar_prefetch=0,
                grid=(nsplits, tiles_per_split),
                in_specs=[
                    pl.BlockSpec((2, tile_b), val_map),    # [y_value; v] lane-dense
                    pl.BlockSpec((tile_b, A), pol_map),    # y_policy
                    pl.BlockSpec((tile_b, A), pol_map),    # policy
                ],
                out_specs=pl.BlockSpec((1, 8, 128), lambda c, i: (c, 0, 0)),
                scratch_shapes=[
                    pltpu.VMEM((8, A), jnp.float32),       # policy partials
                    pltpu.VMEM((1, tile_b), jnp.float32),  # value partials
                ],
            ),
            compiler_params=pltpu.CompilerParams(
                dimension_semantics=dim_sem,
                vmem_limit_bytes=vmem_limit,
            ),
            cost_estimate=cost,
        )(vals, y_policy, policy)

        # Sum per-split partials, normalize by the true batch size.
        return jnp.sum(out[:, 0, 0]) / jnp.float32(B)

    # 2-way CORE_PARALLEL split only on 2-TC chips (v7x); v5e/v6e gain nothing
    # from a split and would pay extra DMA / a duplicate epilogue.
    if _tensorcores_per_chip() >= 2 and n_tiles >= 2:
        try:
            return _build(2, True)
        except Exception:
            return _build(1, False)   # safe fallback if core-parallel path fails
    return _build(1, False)


def _alpha_loss_ref(y_value, v, y_policy, policy):
    ve = (y_value.reshape(-1) - v.reshape(-1)) ** 2
    pe = jnp.sum(-policy * jnp.log(1e-8 + y_policy.astype(jnp.float32)), axis=1)
    return jnp.mean(ve.astype(jnp.float32) + pe)


if __name__ == "__main__":
    # --- small, lane-aligned shapes (single-tile path) ---
    key = jax.random.PRNGKey(0)
    k1, k2, k3, k4 = jax.random.split(key, 4)
    B, A = 16, 128
    y_value = jnp.tanh(jax.random.normal(k1, (B, 1), jnp.float32))
    v = jnp.tanh(jax.random.normal(k2, (B, 1), jnp.float32))
    y_policy = jax.nn.softmax(jax.random.normal(k3, (B, A), jnp.float32), axis=1)
    policy = jax.nn.softmax(jax.random.normal(k4, (B, A), jnp.float32), axis=1)

    out = jax.block_until_ready(alpha_loss(y_value, v, y_policy, policy))
    ref = _alpha_loss_ref(y_value, v, y_policy, policy)
    assert jnp.allclose(out, ref, rtol=1e-4, atol=1e-4), (out, ref)

    # --- ragged batch, single-tile path (B not a multiple of 8) ---
    k5, k6, k7, k8 = jax.random.split(jax.random.PRNGKey(1), 4)
    B2, A2 = 300, 128
    y_value2 = jnp.tanh(jax.random.normal(k5, (B2, 1), jnp.float32))
    v2 = jnp.tanh(jax.random.normal(k6, (B2, 1), jnp.float32))
    y_policy2 = jax.nn.softmax(jax.random.normal(k7, (B2, A2), jnp.float32), axis=1)
    policy2 = jax.nn.softmax(jax.random.normal(k8, (B2, A2), jnp.float32), axis=1)

    out2 = jax.block_until_ready(alpha_loss(y_value2, v2, y_policy2, policy2))
    ref2 = _alpha_loss_ref(y_value2, v2, y_policy2, policy2)
    assert jnp.allclose(out2, ref2, rtol=1e-4, atol=1e-4), (out2, ref2)

    # --- ragged multi-tile path: in-kernel tail masking, no jnp.pad (forced
    #     128-row tiles so 300 rows -> 3 tiles with a masked tail) ---
    out3 = jax.block_until_ready(
        alpha_loss(y_value2, v2, y_policy2, policy2, max_tile_b=128))
    assert jnp.allclose(out3, ref2, rtol=1e-4, atol=1e-4), (out3, ref2)

    print("KERNEL_OK")
</pallas_src>

<mosaic_0001>
module attributes {stable_mosaic.version = 11 : i64} {
  func.func @_alpha_loss_kernel(%arg0: i32, %arg1: i32, %arg2: memref<2x16xf32, #tpu.memory_space<vmem>>, %arg3: memref<16x128xf32, #tpu.memory_space<vmem>>, %arg4: memref<16x128xf32, #tpu.memory_space<vmem>>, %arg5: memref<1x8x128xf32, #tpu.memory_space<vmem>>, %arg6: memref<8x128xf32, #tpu.memory_space<vmem>>, %arg7: memref<1x16xf32, #tpu.memory_space<vmem>>) attributes {dimension_semantics = [#tpu.dimension_semantics<arbitrary>, #tpu.dimension_semantics<arbitrary>], iteration_bounds = array<i64: 1, 1>, scalar_prefetch = 0 : i64, scratch_operands = 2 : i64, tpu.core_type = #tpu.core_type<tc>, window_params = [{transform_indices = @transform_0, window_bounds = array<i64: 2, 16>}, {transform_indices = @transform_1, window_bounds = array<i64: 16, 128>}, {transform_indices = @transform_2, window_bounds = array<i64: 16, 128>}, {transform_indices = @transform_3, window_bounds = array<i64: 1, 8, 128>}]} {
    %c0_i32 = arith.constant 0 : i32
    %0 = arith.cmpi eq, %arg1, %c0_i32 : i32
    %1 = arith.extui %0 : i1 to i32
    %c0_i32_0 = arith.constant 0 : i32
    %2 = arith.cmpi ne, %1, %c0_i32_0 : i32
    scf.if %2 {
      %cst_18 = arith.constant 0.000000e+00 : f32
      %27 = vector.broadcast %cst_18 : f32 to vector<8x128xf32>
      %c0_19 = arith.constant 0 : index
      %c0_20 = arith.constant 0 : index
      %28 = vector.load %arg6[%c0_19, %c0_20] : memref<8x128xf32, #tpu.memory_space<vmem>>, vector<8x128xf32>
      tpu.vector_store %arg6[%c0_19, %c0_20], %27 {strides = array<i32>} : memref<8x128xf32, #tpu.memory_space<vmem>>, vector<8x128xf32>,
      %cst_21 = arith.constant 0.000000e+00 : f32
      %29 = vector.broadcast %cst_21 : f32 to vector<1x16xf32>
      %c0_22 = arith.constant 0 : index
      %c0_23 = arith.constant 0 : index
      %30 = vector.load %arg7[%c0_22, %c0_23] : memref<1x16xf32, #tpu.memory_space<vmem>>, vector<1x16xf32>
      tpu.vector_store %arg7[%c0_22, %c0_23], %29 {strides = array<i32>} : memref<1x16xf32, #tpu.memory_space<vmem>>, vector<1x16xf32>,
    } else {
    }
    %c0 = arith.constant 0 : index
    %c0_1 = arith.constant 0 : index
    %3 = vector.load %arg3[%c0, %c0_1] : memref<16x128xf32, #tpu.memory_space<vmem>>, vector<16x128xf32>
    %c0_2 = arith.constant 0 : index
    %c0_3 = arith.constant 0 : index
    %4 = vector.load %arg4[%c0_2, %c0_3] : memref<16x128xf32, #tpu.memory_space<vmem>>, vector<16x128xf32>
    %c0_4 = arith.constant 0 : index
    %c0_5 = arith.constant 0 : index
    %5 = vector.load %arg2[%c0_4, %c0_5] : memref<2x16xf32, #tpu.memory_space<vmem>>, vector<2x16xf32>
    %6 = vector.extract_strided_slice %5 {offsets = [0, 0], sizes = [1, 16], strides = [1, 1]} : vector<2x16xf32> to vector<1x16xf32>
    %7 = vector.extract_strided_slice %5 {offsets = [1, 0], sizes = [1, 16], strides = [1, 1]} : vector<2x16xf32> to vector<1x16xf32>
    %8 = arith.subf %6, %7 : vector<1x16xf32>
    %9 = arith.mulf %8, %8 : vector<1x16xf32>
    %cst = arith.constant 0.000000e+00 : f32
    %10 = vector.broadcast %cst : f32 to vector<16x128xf32>
    %11 = arith.subf %10, %4 : vector<16x128xf32>
    %cst_6 = arith.constant 9.99999993E-9 : f32
    %12 = vector.broadcast %cst_6 : f32 to vector<16x128xf32>
    %13 = arith.addf %12, %3 : vector<16x128xf32>
    %14 = math.log %13 : vector<16x128xf32>
    %15 = arith.mulf %11, %14 : vector<16x128xf32>
    %c0_7 = arith.constant 0 : index
    %c0_8 = arith.constant 0 : index
    %16 = vector.load %arg6[%c0_7, %c0_8] : memref<8x128xf32, #tpu.memory_space<vmem>>, vector<8x128xf32>
    %17 = vector.shape_cast %15 : vector<16x128xf32> to vector<2x8x128xf32>
    %cst_9 = arith.constant dense<0.000000e+00> : vector<8x128xf32>
    %18 = vector.multi_reduction <add>, %17, %cst_9 [0] : vector<2x8x128xf32> to vector<8x128xf32>
    %19 = arith.addf %16, %18 : vector<8x128xf32>
    %c0_10 = arith.constant 0 : index
    %c0_11 = arith.constant 0 : index
    %20 = vector.load %arg6[%c0_10, %c0_11] : memref<8x128xf32, #tpu.memory_space<vmem>>, vector<8x128xf32>
    tpu.vector_store %arg6[%c0_10, %c0_11], %19 {strides = array<i32>} : memref<8x128xf32, #tpu.memory_space<vmem>>, vector<8x128xf32>,
    %c0_12 = arith.constant 0 : index
    %c0_13 = arith.constant 0 : index
    %21 = vector.load %arg7[%c0_12, %c0_13] : memref<1x16xf32, #tpu.memory_space<vmem>>, vector<1x16xf32>
    %22 = arith.addf %21, %9 : vector<1x16xf32>
    %c0_14 = arith.constant 0 : index
    %c0_15 = arith.constant 0 : index
    %23 = vector.load %arg7[%c0_14, %c0_15] : memref<1x16xf32, #tpu.memory_space<vmem>>, vector<1x16xf32>
    tpu.vector_store %arg7[%c0_14, %c0_15], %22 {strides = array<i32>} : memref<1x16xf32, #tpu.memory_space<vmem>>, vector<1x16xf32>,
    %c0_i32_16 = arith.constant 0 : i32
    %24 = arith.cmpi eq, %arg1, %c0_i32_16 : i32
    %25 = arith.extui %24 : i1 to i32
    %c0_i32_17 = arith.constant 0 : i32
    %26 = arith.cmpi ne, %25, %c0_i32_17 : i32
    scf.if %26 {
      %c0_18 = arith.constant 0 : index
      %c0_19 = arith.constant 0 : index
      %27 = vector.load %arg6[%c0_18, %c0_19] : memref<8x128xf32, #tpu.memory_space<vmem>>, vector<8x128xf32>
      %28 = vector.shape_cast %27 : vector<8x128xf32> to vector<1x8x128xf32>
      %cst_20 = arith.constant dense<0.000000e+00> : vector<1xf32>
      %29 = vector.multi_reduction <add>, %28, %cst_20 [1, 2] : vector<1x8x128xf32> to vector<1xf32>
      %30 = vector.shape_cast %29 : vector<1xf32> to vector<1x1x1xf32>
      %31 = vector.extract %30[0, 0, 0] : f32 from vector<1x1x1xf32>
      %c0_21 = arith.constant 0 : index
      %c0_22 = arith.constant 0 : index
      %32 = vector.load %arg7[%c0_21, %c0_22] : memref<1x16xf32, #tpu.memory_space<vmem>>, vector<1x16xf32>
      %33 = vector.shape_cast %32 : vector<1x16xf32> to vector<1x1x16xf32>
      %cst_23 = arith.constant dense<0.000000e+00> : vector<1xf32>
      %34 = vector.multi_reduction <add>, %33, %cst_23 [1, 2] : vector<1x1x16xf32> to vector<1xf32>
      %35 = vector.shape_cast %34 : vector<1xf32> to vector<1x1x1xf32>
      %36 = vector.extract %35[0, 0, 0] : f32 from vector<1x1x1xf32>
      %37 = arith.addf %31, %36 : f32
      %38 = vector.broadcast %37 : f32 to vector<1x8x128xf32>
      %c0_24 = arith.constant 0 : index
      %c0_25 = arith.constant 0 : index
      %c0_26 = arith.constant 0 : index
      %39 = vector.load %arg5[%c0_24, %c0_25, %c0_26] : memref<1x8x128xf32, #tpu.memory_space<vmem>>, vector<1x8x128xf32>
      tpu.vector_store %arg5[%c0_24, %c0_25, %c0_26], %38 {strides = array<i32>} : memref<1x8x128xf32, #tpu.memory_space<vmem>>, vector<1x8x128xf32>,
    } else {
    }
    return
  }
  func.func @transform_0(%arg0: i32, %arg1: i32) -> (i32, i32) {
    %c1_i32 = arith.constant 1 : i32
    %0 = arith.muli %arg0, %c1_i32 : i32
    %1 = arith.addi %0, %arg1 : i32
    %c0_i32 = arith.constant 0 : i32
    %c0_i32_0 = arith.constant 0 : i32
    return %c0_i32, %1 : i32, i32
  }
  func.func @transform_1(%arg0: i32, %arg1: i32) -> (i32, i32) {
    %c1_i32 = arith.constant 1 : i32
    %0 = arith.muli %arg0, %c1_i32 : i32
    %1 = arith.addi %0, %arg1 : i32
    %c0_i32 = arith.constant 0 : i32
    %c0_i32_0 = arith.constant 0 : i32
    return %1, %c0_i32 : i32, i32
  }
  func.func @transform_2(%arg0: i32, %arg1: i32) -> (i32, i32) {
    %c1_i32 = arith.constant 1 : i32
    %0 = arith.muli %arg0, %c1_i32 : i32
    %1 = arith.addi %0, %arg1 : i32
    %c0_i32 = arith.constant 0 : i32
    %c0_i32_0 = arith.constant 0 : i32
    return %1, %c0_i32 : i32, i32
  }
  func.func @transform_3(%arg0: i32, %arg1: i32) -> (i32, i32, i32) {
    %c0_i32 = arith.constant 0 : i32
    %c0_i32_0 = arith.constant 0 : i32
    %c0_i32_1 = arith.constant 0 : i32
    return %arg0, %c0_i32, %c0_i32_0 : i32, i32, i32
  }
}

</mosaic_0001>

<bundles_post_ra>
// kernel: tpu_custom_call.1
= control target key start
LH: loop header
LB: loop body
LE: loop exit
PB: predicated region body
PF: predicated region fallthrough
CT: control target
= control target key end

     0   :  { %8 = vsyncpa [#allocation5], 0  ;;  %s315_s0 = inlined_call_operand.hbm [shape: f32[2,16], index: 0, kind: input, shape index: {}]   ;;  %s316_s1 = inlined_call_operand.hbm [shape: f32[16,128], index: 1, kind: input, shape index: {}]   ;;  %s317_s2 = inlined_call_operand.hbm [shape: f32[16,128], index: 2, kind: input, shape index: {}]   ;;  %s318_s3 = inlined_call_operand.hbm [shape: f32[1,8,128], index: 3, kind: output, shape index: {}]  }
   0x1   :  { %9 = vsyncpa [#allocation8], 0  ;;  %s33_s14 = sshll.u32 %s316_s1, 4  ;;  %s34_s14 = int_to_ptr.hbm [resolvable:$true] %s33_s14 }
   0x2   :  { %10 = vsyncpa [#allocation6], 0  ;;  %s273_s15 = smov [#allocation7]   ;;  %s19_s19 = sshll.u32 %s315_s0, 4  ;;  %s20_s19 = int_to_ptr.hbm [resolvable:$true] %s19_s19 }
   0x3   :  { %s35_s16 = sshll.u32 %s273_s15, 4  ;;  %s274_s20 = smov 128   ;;  %s36_s16 = int_to_ptr.vmem [resolvable:$true] %s35_s16 }
   0x4   :  { %s275_s21 = smov 8   ;;  %s276_s22 = smov [#allocation4]  }
   0x5   :  { %41 = dma.hbm_to_vmem [thread:$0]  %s34_s14, 256, %s36_s16, [#allocation8], %s274_s20, %s274_s20, %s275_s21  }
   0x6   :  { %s21_s23 = sshll.u32 %s276_s22, 4  ;;  %s50_s26 = sshll.u32 %s317_s2, 4  ;;  %s22_s23 = int_to_ptr.vmem [resolvable:$true] %s21_s23  ;;  %s51_s26 = int_to_ptr.hbm [resolvable:$true] %s50_s26 }
   0x7   :  { %24 = dma.hbm_to_vmem [thread:$0]  %s20_s19, 32, %s22_s23, [#allocation5]  }
   0x8   :  { %s277_s1 = smov [#allocation9]  }
   0x9   :  { %s52_s27 = sshll.u32 %s277_s1, 4  ;;  %s53_s27 = int_to_ptr.vmem [resolvable:$true] %s52_s27 }
   0xa   :  { %58 = dma.hbm_to_vmem [thread:$0]  %s51_s26, 256, %s53_s27, [#allocation8], %s274_s20, %s274_s20, %s275_s21  }
   0xb   :  { %267 = dma.done.wait [#allocation5], 32  }
   0xc   :  { %268 = vsyncadd [#allocation5], 4294967264 }
   0xd   :  { %269 = dma.done.wait [#allocation8], 512  }
   0xe   :  { %270 = vsyncadd [#allocation8], 4294966784  ;;  %vm81_vm0 = vcmask 122880   ;;  %v278_v0 = vmov 0.0   ;;  %v83_v1 = vld [vmem:[#allocation7] sm:$0xff]  ;;  %v84_v2 = vld [vmem:[#allocation7 + $0x8] sm:$0xff] }
   0xf   :  { %82 = vst.msk [vmem:[#allocation3] sm:$0x1] %vm81_vm0, %v278_v0  ;;  %v95_v3 = vadd.f32 1e-08, %v83_v1  ;;  %v96_v4 = vadd.f32 1e-08, %v84_v2 }
  0x10   :  { %v87_v5 = vld [vmem:[#allocation4] sm:$0x3]  ;;  %v85_v7 = vld [vmem:[#allocation9] sm:$0xff]  ;;  %s279_s0 = smov [#allocation10]   ;;  %s145_s4 = sshll.u32 %s318_s3, 4  ;;  %s146_s4 = int_to_ptr.hbm [resolvable:$true] %s145_s4 }
  0x11   :  { %167 = vlog2.f32 %v95_v3  ;;  %v89_v6 = vrot.slane %v87_v5, 1  ;;  %v86_v9 = vld [vmem:[#allocation9 + $0x8] sm:$0xff]  ;;  %v93_v12 = vsub.f32 0.0, %v85_v7  ;;  %s143_s2 = sshll.u32 %s279_s0, 4  ;;  %s144_s2 = int_to_ptr.vmem [resolvable:$true] %s143_s2 }
  0x12   :  { %169 = vlog2.f32 %v96_v4  ;;  %v94_v14 = vsub.f32 0.0, %v86_v9 }
  0x13   :  { %v91_v8 = vsub.f32 %v87_v5, %v89_v6 }
  0x15   :  { %v92_v11 = vmul.f32 %v91_v8, %v91_v8 }
  0x16   :  { %v107_v10 = vld [vmem:[#allocation3] sm:$0x1] }
  0x17   :  { %v168_v13 = vpop.eup %167  ;;  %v108_v15 = vadd.f32 %v107_v10, %v92_v11 }
  0x18   :  { %v170_v16 = vpop.eup %169  ;;  %v98_v17 = vmul.f32 0.6931472, %v168_v13 }
  0x19   :  { %v100_v18 = vmul.f32 0.6931472, %v170_v16  ;;  %110 = vst.msk [vmem:[#allocation3] sm:$0x1] %vm81_vm0, %v108_v15 }
  0x1a   :  { %v101_v19 = vmul.f32 %v98_v17, %v93_v12 }
  0x1b   :  { %v102_v20 = vmul.f32 %v100_v18, %v94_v14 }
  0x1d   :  { %v104_v21 = vadd.f32 %v102_v20, %v101_v19 }
  0x1f   :  { %115 = vadd.xlane.f32.xlu0 %v104_v21 }
  0x20   :  { %v124_v22 = vld [vmem:[#allocation3] sm:$0x1] }
  0x21   :  { %v125_v23 = vsel %vm81_vm0, %v124_v22, 0.0 }
  0x27   :  { %126 = vadd.xlane.f32.xlu0 %v125_v23 }
  0x92   :  { %v116_v24 = vpop.xlane.xlu0 %115 }
  0x93   :  { %v117_v25 = vrot.slane %v116_v24, 4 }
  0x95   :  { %v118_v26 = vadd.f32 %v117_v25, %v116_v24 }
  0x97   :  { %v119_v27 = vrot.slane %v118_v26, 2 }
  0x99   :  { %v120_v28 = vadd.f32 %v119_v27, %v118_v26 }
  0x9a   :  { %v127_v29 = vpop.xlane.xlu0 %126 }
  0x9b   :  { %v128_v30 = vrot.slane %v127_v29, 4  ;;  %v121_v31 = vrot.slane %v120_v28, 1 }
  0x9d   :  { %v129_v32 = vadd.f32 %v128_v30, %v127_v29  ;;  %v122_v33 = vadd.f32 %v121_v31, %v120_v28 }
  0x9f   :  { %v130_v34 = vrot.slane %v129_v32, 2  ;;  %156 = vpush %v122_v33 }
  0xa1   :  { %v131_v35 = vadd.f32 %v130_v34, %v129_v32 }
  0xa3   :  { %v132_v36 = vrot.slane %v131_v35, 1 }
  0xa5   :  { %v133_v37 = vadd.f32 %v132_v36, %v131_v35 }
  0xa7   :  { %158 = vpush %v133_v37 }
  0xd0   :  { %s157_s28 = spop %156 }
  0xd8   :  { %s159_s5 = spop %158 }
  0xd9   :  { %s135_s6 = sadd.f32 %s159_s5, %s157_s28 }
  0xdb   :  { %v136_v38 = vstv %s135_s6 }
  0xdc   :  { %137 = vst [vmem:[#allocation10] sm:$0xff] %v136_v38 }
  0xdd   :  { %148 = dma.vmem_to_hbm [thread:$0]  %s144_s2, 128, %s146_s4, [#allocation6]  }
  0xde   :  { %271 = dma.done.wait [#allocation6], 128  }
  0xdf   :  { %272 = vsyncadd [#allocation6], 4294967168 }
  0xe0   :  { %153 = vsyncpa [#allocation5], 1 }
  0xe1   :  { %154 = vsyncpa [#allocation8], 1 }
  0xe2   :  { %155 = vsyncpa [#allocation6], 1 }

</bundles_post_ra>
